<compile_context>
chip_gen: v5e
topology: v5e:2x2
jax: 0.10.0
libtpu: 0.0.40
codegen_flags: <defaults>
</compile_context>

<pallas_src>
import functools
from collections import namedtuple

import jax
import jax.numpy as jnp
from jax.experimental import pallas as pl
from jax.experimental.pallas import tpu as pltpu

_LANE = 128
_SUBLANE = 8
_TEMP_F32_FACTOR = 6          # concurrent block-sized f32 temporaries inside the kernel
_VMEM_FRACTION = 0.8          # leave compiler headroom below the scoped-VMEM limit


def _round_up(x, m):
    return -(-x // m) * m


def _padded_block_bytes(rows, lanes, itemsize):
    """VMEM footprint of a (rows, lanes) block after sublane/lane padding."""
    sublane = _SUBLANE * max(1, 4 // itemsize)      # 8 (f32) / 16 (bf16) / 32 (int8)
    return _round_up(max(rows, 1), sublane) * _round_up(max(lanes, 1), _LANE) * itemsize


def _vmem_limit_bytes():
    """Generation-aware scoped-VMEM limit (~64 MiB on 128-MiB parts, ~48 MiB on v7x)."""
    cap = 0
    try:
        cap = int(getattr(pltpu.get_tpu_info(), "vmem_capacity_bytes", 0) or 0)
    except Exception:
        cap = 0
    if cap <= 0:
        cap = 64 * 1024 * 1024
    return min(64 * 1024 * 1024, (cap * 3) // 4)


_Plan = namedtuple("_Plan", "Hs R Hl NS TH TL n_hl vmem_limit")


def _choose_plan(C, H, W, itemsize, *, sublane_fold=None, lane_splits=None,
                 rows_per_tile=None):
    # --- sublane fill: smallest Hs with Hs | H and (C * Hs) % 8 == 0 ---
    if sublane_fold is not None:
        Hs = int(sublane_fold)
        if H % Hs != 0:
            raise ValueError("sublane_fold must divide H")
    else:
        Hs = 1
        for hs in range(1, H + 1):
            if H % hs == 0 and (C * hs) % _SUBLANE == 0:
                Hs = hs
                break
    R, Hl = C * Hs, H // Hs

    vmem_limit = _vmem_limit_bytes()
    budget = int(vmem_limit * _VMEM_FRACTION)

    def est_bytes(th):
        tl = th * W
        return (2 * 2 * _padded_block_bytes(R, tl, itemsize)         # 2 inputs, double-buffered
                + _TEMP_F32_FACTOR * _padded_block_bytes(R, tl, 4)   # in-kernel f32 temporaries
                + 2 * 2 * _padded_block_bytes(1, tl, 4)              # resident masks
                + _padded_block_bytes(R, W, 4))                      # carry scratch

    split_prefs = [int(lane_splits)] if lane_splits is not None else [2, 1]
    candidates = []
    for pref, ns in enumerate(split_prefs):
        if ns < 1 or Hl % ns != 0:
            continue
        hls = Hl // ns
        # Lane tiles are whole image rows; below the full lane extent they must
        # fold to a 128-multiple lane width (Pallas (8, 128) block constraint).
        ths = [th for th in range(1, hls + 1)
               if hls % th == 0 and ((th * W) % _LANE == 0 or (ns == 1 and th == hls))]
        if rows_per_tile is not None:
            ths = [th for th in ths if th == int(rows_per_tile)]
        if not ths:
            continue
        fitting = [th for th in ths if est_bytes(th) <= budget]
        # Largest tile that fits the budget; if nothing fits, the *smallest*
        # legal tile (never a whole-image block past the VMEM limit).
        th = max(fitting) if fitting else min(ths)
        candidates.append((not bool(fitting), pref,
                           _Plan(Hs, R, Hl, ns, th, th * W, hls // th, vmem_limit)))
    if not candidates:
        raise ValueError("no feasible tiling for the requested lane_splits / rows_per_tile")
    candidates.sort(key=lambda t: (t[0], t[1]))
    return candidates[0][2]


def _make_kernel(R, W, TL, n_hl, use_roll):
    def kernel(wmask_ref, hmask_ref, clean_ref, noisy_ref, sq_ref, tv_ref, carry_ref):
        # wmask_ref / hmask_ref : (1, TL)  resident masks (constant index_map)
        # clean_ref / noisy_ref : (R, TL)  R = C*Hs sublane rows, TL = TH*W lanes
        # sq_ref / tv_ref       : (1, 128) per-(sample, split) accumulators
        # carry_ref             : (R, W)   last image row of the previous lane tile
        h = pl.program_id(2)

        @pl.when(h == 0)
        def _init():
            sq_ref[...] = jnp.zeros_like(sq_ref)
            tv_ref[...] = jnp.zeros_like(tv_ref)

        c = clean_ref[...].astype(jnp.float32)
        n = noisy_ref[...].astype(jnp.float32)

        # ---- MSE partial: sum of squared error over this tile ----
        d = c - n
        sq_ref[...] += jnp.sum(d * d)

        # ---- anisotropic total variation inside this tile ----
        wmask = wmask_ref[...]
        hmask = hmask_ref[...]
        if use_roll:
            # Lane rotations run on the XLU and avoid the relayout copies that
            # misaligned-lane slices materialize.
            tv_elem = None
            if W > 1:
                right = pltpu.roll(c, shift=TL - 1, axis=1)   # right[:, i] = c[:, (i+1) % TL]
                tv_elem = jnp.abs(right - c) * wmask
            if TL > W:
                below = pltpu.roll(c, shift=TL - W, axis=1)   # below[:, i] = c[:, (i+W) % TL]
                hterm = jnp.abs(below - c) * hmask
                tv_elem = hterm if tv_elem is None else tv_elem + hterm
            if tv_elem is not None:
                tv_ref[...] += jnp.sum(tv_elem)
        else:
            # Small / oddly shaped tiles (lane extent not a multiple of 128):
            # correctness fallback with slice-based diffs.
            tv_t = None
            if W > 1:
                dw = jnp.abs(c[:, 1:] - c[:, :-1])
                tv_t = jnp.sum(dw * wmask[:, : TL - 1])
            if TL > W:
                dh = jnp.sum(jnp.abs(c[:, W:] - c[:, :-W]))
                tv_t = dh if tv_t is None else tv_t + dh
            if tv_t is not None:
                tv_ref[...] += tv_t

        if n_hl > 1:
            # Height pair straddling the previous lane tile of this (sample, split).
            @pl.when(h > 0)
            def _tile_boundary():
                tv_ref[...] += jnp.sum(jnp.abs(c[:, :W] - carry_ref[...]))

            carry_ref[...] = c[:, TL - W:]

    return kernel


def tv_denoise_forward(clean_image, noisy_image, *, sublane_fold=None,
                       lane_splits=None, rows_per_tile=None):
    """Forward of TVDenoise: MSELoss(clean, noisy) + 1e-4 * TotalVariation(clean).

    Returns a (B,) array: the scalar-mean MSE broadcast against the per-sample
    total-variation term, exactly matching the PyTorch/kornia broadcasting.
    """
    assert clean_image.shape == noisy_image.shape and clean_image.ndim == 4
    B, C, H, W = clean_image.shape
    itemsize = jnp.dtype(clean_image.dtype).itemsize

    plan = _choose_plan(C, H, W, itemsize, sublane_fold=sublane_fold,
                        lane_splits=lane_splits, rows_per_tile=rows_per_tile)
    Hs, R, Hl = plan.Hs, plan.R, plan.Hl
    NS, TL, n_hl = plan.NS, plan.TL, plan.n_hl

    # Free (contiguous) reshape: fold Hs image-row chunks onto the sublane axis
    # and the remaining (H/Hs) rows * W onto the lane axis.
    clean_f = clean_image.reshape(B, R, Hl * W)
    noisy_f = noisy_image.reshape(B, R, Hl * W)

    # Loop-invariant masks, hoisted out of the kernel (resident via constant index_map).
    lane = jnp.arange(TL, dtype=jnp.int32)
    wmask = ((lane % W) != (W - 1)).astype(jnp.float32)[None, :]
    hmask = (lane < (TL - W)).astype(jnp.float32)[None, :]

    kernel = _make_kernel(R, W, TL, n_hl, use_roll=(TL % _LANE == 0))

    sq_out, tv_out = pl.pallas_call(
        kernel,
        grid=(B, NS, n_hl),
        in_specs=[
            pl.BlockSpec((1, TL), lambda b, s, h: (0, 0)),
            pl.BlockSpec((1, TL), lambda b, s, h: (0, 0)),
            pl.BlockSpec((None, R, TL), lambda b, s, h: (b, 0, s * n_hl + h)),
            pl.BlockSpec((None, R, TL), lambda b, s, h: (b, 0, s * n_hl + h)),
        ],
        out_specs=[
            pl.BlockSpec((None, 1, _LANE), lambda b, s, h: (b * NS + s, 0, 0)),
            pl.BlockSpec((None, 1, _LANE), lambda b, s, h: (b * NS + s, 0, 0)),
        ],
        out_shape=[
            jax.ShapeDtypeStruct((B * NS, 1, _LANE), jnp.float32),
            jax.ShapeDtypeStruct((B * NS, 1, _LANE), jnp.float32),
        ],
        scratch_shapes=[pltpu.VMEM((R, W), jnp.float32)],
        compiler_params=pltpu.CompilerParams(
            dimension_semantics=("parallel", "parallel", "arbitrary"),
            vmem_limit_bytes=plan.vmem_limit,
        ),
    )(wmask, hmask, clean_f, noisy_f)

    # Each (1, 128) accumulator block holds the per-(sample, split) partial
    # broadcast across all 128 lanes; only lane 0 is read here.
    sq_per_b = sq_out[:, 0, 0].reshape(B, NS).sum(axis=1)
    tv_per_b = tv_out[:, 0, 0].reshape(B, NS).sum(axis=1)

    # Height-difference pairs the kernel skips: rows at sublane-chunk and
    # lane-split boundaries (every (Hl/NS)-th image row).  Tiny strided slice.
    step = Hl // NS
    if step < H:
        hi = clean_image[:, :, step::step, :].astype(jnp.float32)
        lo = clean_image[:, :, step - 1:H - 1:step, :].astype(jnp.float32)
        tv_per_b = tv_per_b + jnp.sum(jnp.abs(hi - lo), axis=(1, 2, 3))

    mse = jnp.sum(sq_per_b) / jnp.float32(B * C * H * W)    # MSELoss(reduction='mean')
    return mse + jnp.float32(1e-4) * tv_per_b               # broadcast -> (B,)


def _reference_forward(clean_image, noisy_image):
    """Pure-JAX reference of the PyTorch/kornia forward, for verification."""
    c = clean_image.astype(jnp.float32)
    n = noisy_image.astype(jnp.float32)
    mse = jnp.mean((c - n) ** 2)
    dif_h = c[:, :, 1:, :] - c[:, :, :-1, :]
    dif_w = c[:, :, :, 1:] - c[:, :, :, :-1]
    tv = jnp.sum(jnp.abs(dif_h), axis=(1, 2, 3)) + jnp.sum(jnp.abs(dif_w), axis=(1, 2, 3))
    return mse + 1e-4 * tv


if __name__ == "__main__":
    root = jax.random.PRNGKey(0)

    cases = [
        # (B, C, H, W, dtype, plan overrides)
        (2, 4, 16, 16, jnp.float32, {}),                                    # canonical small shape
        (2, 4, 64, 64, jnp.float32, dict(lane_splits=2, rows_per_tile=2)),  # carry + split + accum
        (1, 3, 32, 32, jnp.float32, {}),                                    # C=3 sublane fold
        (1, 4, 8, 8, jnp.float32, {}),                                      # slice fallback (TL<128)
        (2, 4, 64, 64, jnp.bfloat16, {}),                                   # bf16 inputs (half HBM)
    ]

    for idx, (B, C, H, W, dtype, overrides) in enumerate(cases):
        k_img, k_noise = jax.random.split(jax.random.fold_in(root, idx))
        base = jax.random.uniform(k_img, (B, C, H, W), dtype=jnp.float32)
        noisy = base + 0.1 * jax.random.normal(k_noise, (B, C, H, W), dtype=jnp.float32)
        noisy = noisy.astype(dtype)

        fwd = jax.jit(functools.partial(tv_denoise_forward, **overrides))

        # Module __init__: the trainable clean_image parameter starts as a copy
        # of the noisy image; also test a partially-denoised estimate so the
        # MSE term is non-zero.
        clean_init = noisy
        clean_mid = (0.5 * (base + noisy.astype(jnp.float32))).astype(dtype)

        for clean in (clean_init, clean_mid):
            ref = _reference_forward(clean, noisy)
            out = jax.block_until_ready(fwd(clean, noisy))
            assert out.shape == (B,), (out.shape, B)
            assert jnp.allclose(out, ref, rtol=1e-4, atol=1e-4), (idx, out, ref)

    # TODO(synk): nn.Parameter / autograd training state is outside the forward pass
    # and is not modelled here.
    print("KERNEL_OK")
</pallas_src>

<mosaic_0001>
module attributes {stable_mosaic.version = 11 : i64} {
  func.func @kernel(%arg0: i32, %arg1: i32, %arg2: i32, %arg3: memref<1x128xf32, #tpu.memory_space<vmem>>, %arg4: memref<1x128xf32, #tpu.memory_space<vmem>>, %arg5: memref<1x8x128xf32, #tpu.memory_space<vmem>>, %arg6: memref<1x8x128xf32, #tpu.memory_space<vmem>>, %arg7: memref<1x1x128xf32, #tpu.memory_space<vmem>>, %arg8: memref<1x1x128xf32, #tpu.memory_space<vmem>>, %arg9: memref<8x16xf32, #tpu.memory_space<vmem>>) attributes {dimension_semantics = [#tpu.dimension_semantics<parallel>, #tpu.dimension_semantics<parallel>, #tpu.dimension_semantics<arbitrary>], iteration_bounds = array<i64: 2, 1, 1>, scalar_prefetch = 0 : i64, scratch_operands = 1 : i64, tpu.core_type = #tpu.core_type<tc>, window_params = [{pipeline_mode = #tpu.pipeline_mode<synchronous>, transform_indices = @transform_0, window_bounds = array<i64: 1, 128>}, {pipeline_mode = #tpu.pipeline_mode<synchronous>, transform_indices = @transform_1, window_bounds = array<i64: 1, 128>}, {transform_indices = @transform_2, window_bounds = array<i64: 1, 8, 128>}, {transform_indices = @transform_3, window_bounds = array<i64: 1, 8, 128>}, {transform_indices = @transform_4, window_bounds = array<i64: 1, 1, 128>}, {transform_indices = @transform_5, window_bounds = array<i64: 1, 1, 128>}]} {
    %c0_i32 = arith.constant 0 : i32
    %0 = arith.cmpi eq, %arg2, %c0_i32 : i32
    %1 = arith.extui %0 : i1 to i32
    %c0_i32_0 = arith.constant 0 : i32
    %2 = arith.cmpi ne, %1, %c0_i32_0 : i32
    scf.if %2 {
      %cst_23 = arith.constant 0.000000e+00 : f32
      %44 = vector.broadcast %cst_23 : f32 to vector<1x128xf32>
      %c0_24 = arith.constant 0 : index
      %c0_25 = arith.constant 0 : index
      %c0_26 = arith.constant 0 : index
      %45 = vector.load %arg7[%c0_24, %c0_25, %c0_26] : memref<1x1x128xf32, #tpu.memory_space<vmem>>, vector<1x1x128xf32>
      %46 = vector.shape_cast %45 : vector<1x1x128xf32> to vector<1x128xf32>
      %47 = vector.shape_cast %44 : vector<1x128xf32> to vector<1x1x128xf32>
      tpu.vector_store %arg7[%c0_24, %c0_25, %c0_26], %47 {strides = array<i32>} : memref<1x1x128xf32, #tpu.memory_space<vmem>>, vector<1x1x128xf32>,
      %cst_27 = arith.constant 0.000000e+00 : f32
      %48 = vector.broadcast %cst_27 : f32 to vector<1x128xf32>
      %c0_28 = arith.constant 0 : index
      %c0_29 = arith.constant 0 : index
      %c0_30 = arith.constant 0 : index
      %49 = vector.load %arg8[%c0_28, %c0_29, %c0_30] : memref<1x1x128xf32, #tpu.memory_space<vmem>>, vector<1x1x128xf32>
      %50 = vector.shape_cast %49 : vector<1x1x128xf32> to vector<1x128xf32>
      %51 = vector.shape_cast %48 : vector<1x128xf32> to vector<1x1x128xf32>
      tpu.vector_store %arg8[%c0_28, %c0_29, %c0_30], %51 {strides = array<i32>} : memref<1x1x128xf32, #tpu.memory_space<vmem>>, vector<1x1x128xf32>,
    } else {
    }
    %c0 = arith.constant 0 : index
    %c0_1 = arith.constant 0 : index
    %c0_2 = arith.constant 0 : index
    %3 = vector.load %arg5[%c0, %c0_1, %c0_2] : memref<1x8x128xf32, #tpu.memory_space<vmem>>, vector<1x8x128xf32>
    %4 = vector.shape_cast %3 : vector<1x8x128xf32> to vector<8x128xf32>
    %c0_3 = arith.constant 0 : index
    %c0_4 = arith.constant 0 : index
    %c0_5 = arith.constant 0 : index
    %5 = vector.load %arg6[%c0_3, %c0_4, %c0_5] : memref<1x8x128xf32, #tpu.memory_space<vmem>>, vector<1x8x128xf32>
    %6 = vector.shape_cast %5 : vector<1x8x128xf32> to vector<8x128xf32>
    %7 = arith.subf %4, %6 : vector<8x128xf32>
    %c0_6 = arith.constant 0 : index
    %c0_7 = arith.constant 0 : index
    %c0_8 = arith.constant 0 : index
    %8 = vector.load %arg7[%c0_6, %c0_7, %c0_8] : memref<1x1x128xf32, #tpu.memory_space<vmem>>, vector<1x1x128xf32>
    %9 = vector.shape_cast %8 : vector<1x1x128xf32> to vector<1x128xf32>
    %10 = arith.mulf %7, %7 : vector<8x128xf32>
    %11 = vector.shape_cast %10 : vector<8x128xf32> to vector<1x8x128xf32>
    %cst = arith.constant dense<0.000000e+00> : vector<1xf32>
    %12 = vector.multi_reduction <add>, %11, %cst [1, 2] : vector<1x8x128xf32> to vector<1xf32>
    %13 = vector.shape_cast %12 : vector<1xf32> to vector<1x1x1xf32>
    %14 = vector.extract %13[0, 0, 0] : f32 from vector<1x1x1xf32>
    %15 = vector.broadcast %14 : f32 to vector<1x128xf32>
    %16 = arith.addf %9, %15 : vector<1x128xf32>
    %c0_9 = arith.constant 0 : index
    %c0_10 = arith.constant 0 : index
    %c0_11 = arith.constant 0 : index
    %17 = vector.load %arg7[%c0_9, %c0_10, %c0_11] : memref<1x1x128xf32, #tpu.memory_space<vmem>>, vector<1x1x128xf32>
    %18 = vector.shape_cast %17 : vector<1x1x128xf32> to vector<1x128xf32>
    %19 = vector.shape_cast %16 : vector<1x128xf32> to vector<1x1x128xf32>
    tpu.vector_store %arg7[%c0_9, %c0_10, %c0_11], %19 {strides = array<i32>} : memref<1x1x128xf32, #tpu.memory_space<vmem>>, vector<1x1x128xf32>,
    %c0_12 = arith.constant 0 : index
    %c0_13 = arith.constant 0 : index
    %20 = vector.load %arg3[%c0_12, %c0_13] : memref<1x128xf32, #tpu.memory_space<vmem>>, vector<1x128xf32>
    %c0_14 = arith.constant 0 : index
    %c0_15 = arith.constant 0 : index
    %21 = vector.load %arg4[%c0_14, %c0_15] : memref<1x128xf32, #tpu.memory_space<vmem>>, vector<1x128xf32>
    %c127_i32 = arith.constant 127 : i32
    %22 = tpu.dynamic_rotate %4 by %c127_i32 dim 1 : vector<8x128xf32>, i32 -> vector<8x128xf32>
    %23 = arith.subf %22, %4 : vector<8x128xf32>
    %24 = math.absf %23 : vector<8x128xf32>
    %25 = vector.broadcast %20 : vector<1x128xf32> to vector<8x128xf32>
    %26 = arith.mulf %24, %25 : vector<8x128xf32>
    %c112_i32 = arith.constant 112 : i32
    %27 = tpu.dynamic_rotate %4 by %c112_i32 dim 1 : vector<8x128xf32>, i32 -> vector<8x128xf32>
    %28 = arith.subf %27, %4 : vector<8x128xf32>
    %29 = math.absf %28 : vector<8x128xf32>
    %30 = vector.broadcast %21 : vector<1x128xf32> to vector<8x128xf32>
    %31 = arith.mulf %29, %30 : vector<8x128xf32>
    %32 = arith.addf %26, %31 : vector<8x128xf32>
    %c0_16 = arith.constant 0 : index
    %c0_17 = arith.constant 0 : index
    %c0_18 = arith.constant 0 : index
    %33 = vector.load %arg8[%c0_16, %c0_17, %c0_18] : memref<1x1x128xf32, #tpu.memory_space<vmem>>, vector<1x1x128xf32>
    %34 = vector.shape_cast %33 : vector<1x1x128xf32> to vector<1x128xf32>
    %35 = vector.shape_cast %32 : vector<8x128xf32> to vector<1x8x128xf32>
    %cst_19 = arith.constant dense<0.000000e+00> : vector<1xf32>
    %36 = vector.multi_reduction <add>, %35, %cst_19 [1, 2] : vector<1x8x128xf32> to vector<1xf32>
    %37 = vector.shape_cast %36 : vector<1xf32> to vector<1x1x1xf32>
    %38 = vector.extract %37[0, 0, 0] : f32 from vector<1x1x1xf32>
    %39 = vector.broadcast %38 : f32 to vector<1x128xf32>
    %40 = arith.addf %34, %39 : vector<1x128xf32>
    %c0_20 = arith.constant 0 : index
    %c0_21 = arith.constant 0 : index
    %c0_22 = arith.constant 0 : index
    %41 = vector.load %arg8[%c0_20, %c0_21, %c0_22] : memref<1x1x128xf32, #tpu.memory_space<vmem>>, vector<1x1x128xf32>
    %42 = vector.shape_cast %41 : vector<1x1x128xf32> to vector<1x128xf32>
    %43 = vector.shape_cast %40 : vector<1x128xf32> to vector<1x1x128xf32>
    tpu.vector_store %arg8[%c0_20, %c0_21, %c0_22], %43 {strides = array<i32>} : memref<1x1x128xf32, #tpu.memory_space<vmem>>, vector<1x1x128xf32>,
    return
  }
  func.func @transform_0(%arg0: i32, %arg1: i32, %arg2: i32) -> (i32, i32) {
    %c0_i32 = arith.constant 0 : i32
    %c0_i32_0 = arith.constant 0 : i32
    %c0_i32_1 = arith.constant 0 : i32
    return %c0_i32, %c0_i32_0 : i32, i32
  }
  func.func @transform_1(%arg0: i32, %arg1: i32, %arg2: i32) -> (i32, i32) {
    %c0_i32 = arith.constant 0 : i32
    %c0_i32_0 = arith.constant 0 : i32
    %c0_i32_1 = arith.constant 0 : i32
    return %c0_i32, %c0_i32_0 : i32, i32
  }
  func.func @transform_2(%arg0: i32, %arg1: i32, %arg2: i32) -> (i32, i32, i32) {
    %c1_i32 = arith.constant 1 : i32
    %0 = arith.muli %arg1, %c1_i32 : i32
    %1 = arith.addi %0, %arg2 : i32
    %c0_i32 = arith.constant 0 : i32
    %c0_i32_0 = arith.constant 0 : i32
    return %arg0, %c0_i32, %1 : i32, i32, i32
  }
  func.func @transform_3(%arg0: i32, %arg1: i32, %arg2: i32) -> (i32, i32, i32) {
    %c1_i32 = arith.constant 1 : i32
    %0 = arith.muli %arg1, %c1_i32 : i32
    %1 = arith.addi %0, %arg2 : i32
    %c0_i32 = arith.constant 0 : i32
    %c0_i32_0 = arith.constant 0 : i32
    return %arg0, %c0_i32, %1 : i32, i32, i32
  }
  func.func @transform_4(%arg0: i32, %arg1: i32, %arg2: i32) -> (i32, i32, i32) {
    %c1_i32 = arith.constant 1 : i32
    %0 = arith.muli %arg0, %c1_i32 : i32
    %1 = arith.addi %0, %arg1 : i32
    %c0_i32 = arith.constant 0 : i32
    %c0_i32_0 = arith.constant 0 : i32
    %c0_i32_1 = arith.constant 0 : i32
    return %1, %c0_i32, %c0_i32_0 : i32, i32, i32
  }
  func.func @transform_5(%arg0: i32, %arg1: i32, %arg2: i32) -> (i32, i32, i32) {
    %c1_i32 = arith.constant 1 : i32
    %0 = arith.muli %arg0, %c1_i32 : i32
    %1 = arith.addi %0, %arg1 : i32
    %c0_i32 = arith.constant 0 : i32
    %c0_i32_0 = arith.constant 0 : i32
    %c0_i32_1 = arith.constant 0 : i32
    return %1, %c0_i32, %c0_i32_0 : i32, i32, i32
  }
}

</mosaic_0001>

<bundles_post_ra>
// kernel: tv_denoise_forward.1
= control target key start
LH: loop header
LB: loop body
LE: loop exit
PB: predicated region body
PF: predicated region fallthrough
CT: control target
= control target key end

     0   :  { %s571_s18 = smov 0   ;;  %s573_s19 = smov 0   ;;  %s621_s0 = inlined_call_operand.vmem [shape: f32[1,128], index: 0, kind: input, shape index: {}]   ;;  %s622_s1 = inlined_call_operand.vmem [shape: f32[1,128], index: 1, kind: input, shape index: {}]   ;;  %s623_s2 = inlined_call_operand.vmem [shape: f32[2,8,128], index: 2, kind: input, shape index: {}]   ;;  %s624_s3 = inlined_call_operand.vmem [shape: f32[2,8,128], index: 3, kind: input, shape index: {}]   ;;  %s625_s4 = inlined_call_operand.vmem [shape: f32[2,1,128], index: 4, kind: output, shape index: {0}]   ;;  %s626_s5 = inlined_call_operand.vmem [shape: f32[2,1,128], index: 5, kind: output, shape index: {1}]  }
   0x1   :  { %s575_s20 = smov 0  }
   0x2 LB: > { %s35_s21 = sadd.s32 1, %s532_s19  ;;  %p476_p0 = scmp.ge.s32.totalorder %s536_s20, 1  ;;  %s536_s20 = sphi %s575_s20, %s16_s20   ;;  %s532_s19 = sphi %s573_s19, %s628_s19   ;;  %s528_s18 = sphi %s571_s18, %s627_s18  }
   0x3   : > { %p37_p1 = scmp.ge.s32.totalorder %s35_s21, 2  ;;  %p239_p2 = scmp.lt.s32.totalorder %s536_s20, 3 }
   0x5   : > { %s630_s21 = smov (%p37_p1, %s35_s21), 0  ;;  %p240_p3 = pnand %p476_p0, %p239_p2 }
   0x6   : > { %p282_p4 = scmp.lt.s32.totalorder (!%p240_p3), %s528_s18, 1  ;;  %s538_s26 = smov (!%p240_p3), 127  }
   0x7   : > { %243 = sbr.rel (%p240_p3) target bundleno = 329 (0x149), region = 36  ;;  %s539_s27 = smov (!%p240_p3), 112  }
   0xc   : > { %s632_s18 = smov (!%p282_p4, %s528_s18), 1  ;;  %v512_v7 = vld [vmem:[%s621_s0] ss:$0 sm:$0xff]  ;;  %v540_v22 = vmov 0.0  }
   0xd   : > { %s477_s22 = sshll.u32 %s632_s18, 3  ;;  %v513_v9 = vld [vmem:[%s622_s1] ss:$0 sm:$0xff]  ;;  %s302_s12 = scalar_lea.vmem %s625_s4, %s632_s18 }
   0xe   : > { %s288_s25 = scalar_lea.vmem %s623_s2, %s477_s22  ;;  %s297_s30 = scalar_lea.vmem %s624_s3, %s477_s22  ;;  %313 = vst [vmem:[%s302_s12] sm:$0x1] %v540_v22 }
   0xf   : > { %v315_v0 = vld [vmem:[%s288_s25] sm:$0xff]  ;;  %s307_s15 = scalar_lea.vmem %s626_s5, %s632_s18 }
  0x10   : > { %334 = vrot.lane.b32.xlu0 %v315_v0, %s538_s26  ;;  %v316_v1 = vld [vmem:[%s297_s30] sm:$0xff]  ;;  %314 = vst [vmem:[%s307_s15] sm:$0x1] %v540_v22 }
  0x11   : > { %v317_v2 = vsub.f32 %v315_v0, %v316_v1 }
  0x13   : > { %v319_v3 = vmul.f32 %v317_v2, %v317_v2 }
  0x15   : > { %320 = vadd.xlane.f32.xlu1 %v319_v3  ;;  %v318_v30 = vld [vmem:[%s302_s12] sm:$0x1] }
  0x17   : > { %v351_v33 = vld [vmem:[%s307_s15] sm:$0x1] }
  0x18   : > { %342 = vrot.lane.b32.xlu0 %v315_v0, %s539_s27 }
  0x82   : > { %v335_v4 = vpop.permute.xlu0 %334 }
  0x83   : > { %v336_v5 = vsub.f32 %v335_v4, %v315_v0 }
  0x85   : > { %v337_v8 = vand.u32 2147483647, %v336_v5 }
  0x87   : > { %v341_v12 = vmul.f32 %v512_v7, %v337_v8 }
  0x88   : > { %v321_v15 = vpop.xlane.xlu1 %320 }
  0x89   : > { %v322_v16 = vrot.slane %v321_v15, 4 }
  0x8a   : > { %v343_v6 = vpop.permute.xlu0 %342 }
  0x8b   : > { %v344_v10 = vsub.f32 %v343_v6, %v315_v0  ;;  %v323_v17 = vadd.f32 %v322_v16, %v321_v15 }
  0x8d   : > { %v345_v11 = vand.u32 2147483647, %v344_v10  ;;  %v324_v18 = vrot.slane %v323_v17, 2 }
  0x8f   : > { %v349_v13 = vmul.f32 %v513_v9, %v345_v11  ;;  %v325_v19 = vadd.f32 %v324_v18, %v323_v17 }
  0x91   : > { %v350_v14 = vadd.f32 %v349_v13, %v341_v12  ;;  %v326_v20 = vrot.slane %v325_v19, 1 }
  0x93   : > { %352 = vadd.xlane.f32.xlu1 %v350_v14  ;;  %v327_v21 = vadd.f32 %v326_v20, %v325_v19 }
  0x95   : > { %481 = vpush %v327_v21 }
  0xc6   : > { %s482_s16 = spop %481 }
  0xc7   : > { %v329_v31 = vstv %s482_s16 }
  0xc8   : > { %v330_v32 = vadd.f32 %v329_v31, %v318_v30 }
  0xca   : > { %331 = vst [vmem:[%s302_s12] sm:$0x1] %v330_v32 }
 0x106   : > { %v353_v23 = vpop.xlane.xlu1 %352 }
 0x107   : > { %v354_v24 = vrot.slane %v353_v23, 4 }
 0x109   : > { %v355_v25 = vadd.f32 %v354_v24, %v353_v23 }
 0x10b   : > { %v356_v26 = vrot.slane %v355_v25, 2 }
 0x10d   : > { %v357_v27 = vadd.f32 %v356_v26, %v355_v25 }
 0x10f   : > { %v358_v28 = vrot.slane %v357_v27, 1 }
 0x111   : > { %v359_v29 = vadd.f32 %v358_v28, %v357_v27 }
 0x113   : > { %483 = vpush %v359_v29 }
 0x144   : > { %s484_s17 = spop %483 }
 0x145   : > { %v361_v34 = vstv %s484_s17 }
 0x146   : > { %v362_v35 = vadd.f32 %v361_v34, %v351_v33 }
 0x148   : > { %363 = vst [vmem:[%s307_s15] sm:$0x1] %v362_v35 }
 0x149 PF: > { %s16_s20 = sadd.s32 1, %s536_s20   ;;  %s627_s18 = smov %s532_s19 }
 0x14a   : > { %p13_p5 = scmp.ge.s32.totalorder %s16_s20, 4   ;;  %s628_s19 = smov %s630_s21 }
 0x14c   :  { %15 = sbr.rel (!%p13_p5) target bundleno = 2 (0x2), region = 85 }

</bundles_post_ra>
